<compile_context>
chip_gen: v7x
topology: tpu7x:2x2x1
jax: 0.10.0
libtpu: 0.0.40
codegen_flags: <defaults>
</compile_context>

<pallas_src>
import functools

import numpy as np
import jax
import jax.numpy as jnp
from jax import lax
from jax.experimental import pallas as pl
from jax.experimental.pallas import tpu as pltpu


def _round_up(a, b):
    return ((a + b - 1) // b) * b


def _choose_tk(N, d, itemsize):
    # Keep one double-buffered x-tile around ~4 MiB, multiple of 128, and no
    # bigger than the (128-rounded) batch itself.
    cap_rows = max(128, ((4 * 1024 * 1024) // max(d * itemsize, 1)) // 128 * 128)
    tk = min(512, cap_rows, _round_up(N, 128))
    return max(128, int(tk))


def _cpm_kernel(sizes_ref, lab_ref, tgt_ref, x_ref, o_ref, acc_ref, cnt_ref,
                *, margin):
    # sizes_ref: SMEM (2,) int32  -> [n_true, N_true]
    # lab_ref:   (n_pad, 1) int32 unique labels (padded rows = -1)
    # tgt_ref:   (1, TK)   int32 targets tile (last tile may be partial)
    # x_ref:     (TK, d)   feature tile (last tile may be partial)
    # o_ref:     SMEM (1, 1) f32 scalar loss
    # acc_ref:   (n_pad, d) f32 center-sum accumulator (VMEM scratch)
    # cnt_ref:   (n_pad, 1) f32 per-label count accumulator (VMEM scratch)
    k = pl.program_id(0)
    nk = pl.num_programs(0)

    @pl.when(k == 0)
    def _init():
        acc_ref[...] = jnp.zeros_like(acc_ref)
        cnt_ref[...] = jnp.zeros_like(cnt_ref)

    n_true = sizes_ref[0]
    n_total = sizes_ref[1]

    labels = lab_ref[...]                       # (n_pad, 1)
    tgt = tgt_ref[...]                          # (1, TK)
    n_pad = labels.shape[0]
    tk = tgt.shape[1]

    # One-hot for this K-tile built on the VPU (free under the HBM roofline).
    # Column mask kills out-of-batch columns of a partial last tile; row mask
    # kills padded label rows.
    col_ids = lax.broadcasted_iota(jnp.int32, (n_pad, tk), 1) + k * tk
    row_ids = lax.broadcasted_iota(jnp.int32, (n_pad, tk), 0)
    match = (labels == tgt) & (col_ids < n_total) & (row_ids < n_true)
    onehot = match.astype(x_ref.dtype)          # (n_pad, TK)

    # Zero the out-of-bounds rows of a partial x tile before touching the MXU:
    # the padding region of a partial block is unspecified (could be non-finite).
    xv = x_ref[...]                             # (TK, d)
    xrow = lax.broadcasted_iota(jnp.int32, (tk, 1), 0) + k * tk
    xv = jnp.where(xrow < n_total, xv, jnp.zeros_like(xv))

    # Per-label feature sums (MXU, f32 accumulate) and counts (XLU reduce).
    acc_ref[...] += jnp.dot(onehot, xv, preferred_element_type=jnp.float32)
    cnt_ref[...] += jnp.sum(match.astype(jnp.float32), axis=1, keepdims=True)

    @pl.when(k == nk - 1)
    def _finalize():
        counts = jnp.maximum(cnt_ref[...], 1.0)
        center = acc_ref[...] / counts                           # (n_pad, d) f32 means

        # Pairwise squared Euclidean distances between centers.
        sq = jnp.sum(center * center, axis=1, keepdims=True)     # (n_pad, 1)
        gram = lax.dot_general(center, center, (((1,), (1,)), ((), ())),
                               preferred_element_type=jnp.float32)
        dist2 = sq + jnp.transpose(sq) - 2.0 * gram              # (n_pad, n_pad)

        rows = lax.broadcasted_iota(jnp.int32, (n_pad, n_pad), 0)
        cols = lax.broadcasted_iota(jnp.int32, (n_pad, n_pad), 1)
        eye = rows == cols

        # ap = dist[mask].max per row == sqrt(clamp(diag(dist2)))  (mask = identity)
        diag2 = jnp.sum(jnp.where(eye, dist2, 0.0), axis=1, keepdims=True)
        ap = jnp.sqrt(jnp.maximum(diag2, 1e-12))

        # an = min over valid off-diagonal of dist == sqrt(clamp(min off-diag dist2))
        neg_ok = (cols < n_true) & jnp.logical_not(eye)
        an2 = jnp.min(jnp.where(neg_ok, dist2, jnp.float32(1e30)),
                      axis=1, keepdims=True)
        an = jnp.sqrt(jnp.maximum(an2, 1e-12))

        # MarginRankingLoss(an, ap, ones) = mean(max(0, ap - an + margin))
        hinge = jnp.maximum(ap - an + jnp.float32(margin), 0.0)   # (n_pad, 1)
        valid = lax.broadcasted_iota(jnp.int32, (n_pad, 1), 0) < n_true
        loss = jnp.sum(jnp.where(valid, hinge, 0.0)) / n_true.astype(jnp.float32)
        o_ref[0, 0] = loss


def cpm_loss(inputs, targets, margin=0.2, block_rows=None):
    """Pallas-backed CPMLoss forward. inputs: (N, d) float, targets: (N,) int."""
    inputs = jnp.asarray(inputs)
    if inputs.dtype != jnp.bfloat16 and inputs.dtype != jnp.float32:
        inputs = inputs.astype(jnp.float32)
    targets_np = np.asarray(jax.device_get(targets)).astype(np.int32)
    if inputs.ndim != 2 or targets_np.ndim != 1 or inputs.shape[0] != targets_np.shape[0]:
        raise ValueError(f"shape mismatch: inputs {inputs.shape}, targets {targets_np.shape}")

    unique_labels = np.unique(targets_np)       # sorted, matches torch.unique()
    n = int(unique_labels.shape[0])
    if n < 2:
        return jnp.asarray(0.01, dtype=jnp.float32)

    N, d = inputs.shape
    itemsize = int(np.dtype(inputs.dtype).itemsize)
    n_pad = max(8, _round_up(n, 8))             # sublane bucketing; avoids per-n recompiles
    if block_rows is None:
        tk = _choose_tk(N, d, itemsize)
    else:
        tk = max(128, _round_up(int(block_rows), 128))
    num_k = -(-N // tk)                         # cdiv; last block may be partial (masked)

    labels_pad = np.full((n_pad, 1), -1, np.int32)
    labels_pad[:n, 0] = unique_labels
    targets_row = jnp.asarray(targets_np.reshape(1, N))
    sizes = jnp.array([n, N], dtype=jnp.int32)

    # Rough VMEM need: double-buffered x + targets tiles, labels, accumulators.
    est_vmem = (2 * (tk * d * itemsize + tk * 4) + 2 * n_pad * 4
                + n_pad * d * 4 + n_pad * 4 + (2 << 20))
    cp_kwargs = dict(dimension_semantics=("arbitrary",))
    if est_vmem > 12 * 1024 * 1024:
        cp_kwargs["vmem_limit_bytes"] = min(int(est_vmem * 2), 64 * 1024 * 1024)

    grid_spec = pltpu.PrefetchScalarGridSpec(
        num_scalar_prefetch=1,
        grid=(num_k,),
        in_specs=[
            pl.BlockSpec((n_pad, 1), lambda k, s: (0, 0)),   # labels (resident)
            pl.BlockSpec((1, tk), lambda k, s: (0, k)),      # targets tile
            pl.BlockSpec((tk, d), lambda k, s: (k, 0)),      # x tile (streamed)
        ],
        out_specs=pl.BlockSpec(memory_space=pltpu.MemorySpace.SMEM),
        scratch_shapes=[
            pltpu.VMEM((n_pad, d), jnp.float32),             # center-sum accumulator
            pltpu.VMEM((n_pad, 1), jnp.float32),             # count accumulator
        ],
    )

    out = pl.pallas_call(
        functools.partial(_cpm_kernel, margin=float(margin)),
        out_shape=jax.ShapeDtypeStruct((1, 1), jnp.float32),
        grid_spec=grid_spec,
        compiler_params=pltpu.CompilerParams(**cp_kwargs),
    )(sizes, jnp.asarray(labels_pad), targets_row, inputs)

    loss = out[0, 0]
    # nan/inf guard (torch returns 0.0 in that case)
    loss = jnp.where(jnp.isnan(loss) | jnp.isinf(loss), jnp.float32(0.0), loss)
    return loss


def _cpm_loss_ref_numpy(inputs, targets, margin=0.2):
    """Pure numpy reference reproducing the PyTorch forward."""
    x = np.asarray(inputs, dtype=np.float32)
    t = np.asarray(targets)
    labels = np.unique(t)
    n = len(labels)
    if n < 2:
        return np.float32(0.01)
    center = np.stack([x[t == lb].mean(axis=0) for lb in labels])
    sq = (center ** 2).sum(axis=1, keepdims=True)
    dist2 = sq + sq.T - 2.0 * center @ center.T
    dist = np.sqrt(np.clip(dist2, 1e-12, None))
    mask = labels[None, :] == labels[:, None]
    ap = np.where(mask, dist, -np.inf).max(axis=1)
    an = np.where(mask, np.inf, dist).min(axis=1)
    loss = np.maximum(ap - an + margin, 0.0).mean()
    if np.isnan(loss) or np.isinf(loss):
        return np.float32(0.0)
    return np.float32(loss)


if __name__ == "__main__":
    key = jax.random.PRNGKey(0)

    # Case 1: small canonical shape (N=8, d=32, 4 labels), several margins.
    N, d = 8, 32
    inputs = jax.random.normal(key, (N, d), dtype=jnp.float32)
    targets = jnp.array([0, 0, 1, 1, 2, 2, 3, 3], dtype=jnp.int32)
    for m in (0.2, 1.0, 5.0):
        loss = jax.block_until_ready(cpm_loss(inputs, targets, margin=m))
        ref = _cpm_loss_ref_numpy(np.asarray(inputs), np.asarray(targets), margin=m)
        np.testing.assert_allclose(np.asarray(loss), ref, rtol=1e-3, atol=2e-3)

    # Case 2: N not a tile multiple, 8 labels, active hinge (tight clusters).
    key2 = jax.random.PRNGKey(1)
    N2, d2 = 20, 32
    inputs2 = jax.random.normal(key2, (N2, d2), dtype=jnp.float32) * 0.1
    targets2 = jnp.array([0, 0, 0, 1, 1, 2, 2, 2, 2, 3, 3, 4, 4, 4, 5, 5, 6, 6, 7, 7],
                         dtype=jnp.int32)
    loss2 = jax.block_until_ready(cpm_loss(inputs2, targets2, margin=0.5))
    ref2 = _cpm_loss_ref_numpy(np.asarray(inputs2), np.asarray(targets2), margin=0.5)
    np.testing.assert_allclose(np.asarray(loss2), ref2, rtol=1e-3, atol=2e-3)

    # Case 3: multi-tile grid with a ragged last tile (forced TK=128, N=260).
    key3 = jax.random.PRNGKey(2)
    N3, d3, nlab3 = 260, 32, 10
    inputs3 = jax.random.normal(key3, (N3, d3), dtype=jnp.float32)
    targets3_np = (np.arange(N3) % nlab3).astype(np.int32)
    rng = np.random.RandomState(0)
    rng.shuffle(targets3_np)
    targets3 = jnp.asarray(targets3_np)
    loss3 = jax.block_until_ready(cpm_loss(inputs3, targets3, margin=1.0, block_rows=128))
    ref3 = _cpm_loss_ref_numpy(np.asarray(inputs3), targets3_np, margin=1.0)
    np.testing.assert_allclose(np.asarray(loss3), ref3, rtol=1e-3, atol=2e-3)

    # Case 4: fewer than 2 unique labels -> early return 0.01 (no kernel call).
    loss4 = cpm_loss(inputs, jnp.zeros((N,), dtype=jnp.int32))
    assert abs(float(loss4) - 0.01) < 1e-7

    print("KERNEL_OK")
</pallas_src>

<mosaic_0001>
module attributes {stable_mosaic.version = 11 : i64} {
  func.func @_cpm_kernel(%arg0: i32, %arg1: memref<2xi32, #tpu.memory_space<smem>>, %arg2: memref<8x1xi32, #tpu.memory_space<vmem>>, %arg3: memref<1x128xi32, #tpu.memory_space<vmem>>, %arg4: memref<128x32xf32, #tpu.memory_space<vmem>>, %arg5: memref<1x1xf32, #tpu.memory_space<smem>>, %arg6: memref<8x32xf32, #tpu.memory_space<vmem>>, %arg7: memref<8x1xf32, #tpu.memory_space<vmem>>) attributes {dimension_semantics = [#tpu.dimension_semantics<arbitrary>], iteration_bounds = array<i64: 1>, scalar_prefetch = 1 : i64, scratch_operands = 2 : i64, tpu.core_type = #tpu.core_type<tc>, window_params = [{pipeline_mode = #tpu.pipeline_mode<synchronous>, transform_indices = @transform_0, window_bounds = array<i64: 8, 1>}, {transform_indices = @transform_1, window_bounds = array<i64: 1, 128>}, {transform_indices = @transform_2, window_bounds = array<i64: 128, 32>}, {transform_indices = @transform_3, window_bounds = array<i64: 1, 1>}]} {
    %c0_i32 = arith.constant 0 : i32
    %0 = arith.cmpi eq, %arg0, %c0_i32 : i32
    %1 = arith.extui %0 : i1 to i32
    %c0_i32_0 = arith.constant 0 : i32
    %2 = arith.cmpi ne, %1, %c0_i32_0 : i32
    scf.if %2 {
      %cst_20 = arith.constant 0.000000e+00 : f32
      %48 = vector.broadcast %cst_20 : f32 to vector<8x32xf32>
      %c0_21 = arith.constant 0 : index
      %c0_22 = arith.constant 0 : index
      %49 = vector.load %arg6[%c0_21, %c0_22] : memref<8x32xf32, #tpu.memory_space<vmem>>, vector<8x32xf32>
      tpu.vector_store %arg6[%c0_21, %c0_22], %48 {strides = array<i32>} : memref<8x32xf32, #tpu.memory_space<vmem>>, vector<8x32xf32>,
      %cst_23 = arith.constant 0.000000e+00 : f32
      %50 = vector.broadcast %cst_23 : f32 to vector<8x1xf32>
      %c0_24 = arith.constant 0 : index
      %c0_25 = arith.constant 0 : index
      %51 = vector.load %arg7[%c0_24, %c0_25] : memref<8x1xf32, #tpu.memory_space<vmem>>, vector<8x1xf32>
      tpu.vector_store %arg7[%c0_24, %c0_25], %50 {strides = array<i32>} : memref<8x1xf32, #tpu.memory_space<vmem>>, vector<8x1xf32>,
    } else {
    }
    %c0 = arith.constant 0 : index
    %3 = memref.load %arg1[%c0] : memref<2xi32, #tpu.memory_space<smem>>
    %c1 = arith.constant 1 : index
    %4 = memref.load %arg1[%c1] : memref<2xi32, #tpu.memory_space<smem>>
    %c0_1 = arith.constant 0 : index
    %c0_2 = arith.constant 0 : index
    %5 = vector.load %arg2[%c0_1, %c0_2] : memref<8x1xi32, #tpu.memory_space<vmem>>, vector<8x1xi32>
    %c0_3 = arith.constant 0 : index
    %c0_4 = arith.constant 0 : index
    %6 = vector.load %arg3[%c0_3, %c0_4] : memref<1x128xi32, #tpu.memory_space<vmem>>, vector<1x128xi32>
    %7 = tpu.iota {dimensions = array<i32: 1>} : vector<8x128xi32>
    %c128_i32 = arith.constant 128 : i32
    %8 = arith.muli %arg0, %c128_i32 : i32
    %9 = vector.broadcast %8 : i32 to vector<8x128xi32>
    %10 = arith.addi %7, %9 : vector<8x128xi32>
    %11 = tpu.iota {dimensions = array<i32: 0>} : vector<8x128xi32>
    %12 = vector.broadcast %5 : vector<8x1xi32> to vector<8x128xi32>
    %13 = vector.broadcast %6 : vector<1x128xi32> to vector<8x128xi32>
    %14 = arith.cmpi eq, %12, %13 : vector<8x128xi32>
    %15 = vector.broadcast %4 : i32 to vector<8x128xi32>
    %16 = arith.cmpi slt, %10, %15 : vector<8x128xi32>
    %17 = arith.andi %14, %16 : vector<8x128xi1>
    %18 = vector.broadcast %3 : i32 to vector<8x128xi32>
    %19 = arith.cmpi slt, %11, %18 : vector<8x128xi32>
    %20 = arith.andi %17, %19 : vector<8x128xi1>
    %21 = arith.extui %20 : vector<8x128xi1> to vector<8x128xi32>
    %22 = arith.sitofp %21 : vector<8x128xi32> to vector<8x128xf32>
    %c0_5 = arith.constant 0 : index
    %c0_6 = arith.constant 0 : index
    %23 = vector.load %arg4[%c0_5, %c0_6] : memref<128x32xf32, #tpu.memory_space<vmem>>, vector<128x32xf32>
    %24 = tpu.iota {dimensions = array<i32: 0>} : vector<128x1xi32>
    %c128_i32_7 = arith.constant 128 : i32
    %25 = arith.muli %arg0, %c128_i32_7 : i32
    %26 = vector.broadcast %25 : i32 to vector<128x1xi32>
    %27 = arith.addi %24, %26 : vector<128x1xi32>
    %28 = vector.broadcast %4 : i32 to vector<128x1xi32>
    %29 = arith.cmpi slt, %27, %28 : vector<128x1xi32>
    %cst = arith.constant 0.000000e+00 : f32
    %30 = vector.broadcast %cst : f32 to vector<128x32xf32>
    %31 = vector.shape_cast %29 : vector<128x1xi1> to vector<128x1xi1>
    %32 = vector.broadcast %31 : vector<128x1xi1> to vector<128x32xi1>
    %33 = arith.select %32, %23, %30 : vector<128x32xi1>, vector<128x32xf32>
    %c0_8 = arith.constant 0 : index
    %c0_9 = arith.constant 0 : index
    %34 = vector.load %arg6[%c0_8, %c0_9] : memref<8x32xf32, #tpu.memory_space<vmem>>, vector<8x32xf32>
    %cst_10 = arith.constant dense<0.000000e+00> : vector<8x32xf32>
    %35 = tpu.matmul %22, %33, %cst_10 {dimension_numbers = #tpu.dot_dimension_numbers<[1], [0], [0], [1], [0, 0, 1, 1], [], []>} : vector<8x128xf32>, vector<128x32xf32>, vector<8x32xf32> -> vector<8x32xf32>
    %36 = arith.addf %34, %35 : vector<8x32xf32>
    %c0_11 = arith.constant 0 : index
    %c0_12 = arith.constant 0 : index
    %37 = vector.load %arg6[%c0_11, %c0_12] : memref<8x32xf32, #tpu.memory_space<vmem>>, vector<8x32xf32>
    tpu.vector_store %arg6[%c0_11, %c0_12], %36 {strides = array<i32>} : memref<8x32xf32, #tpu.memory_space<vmem>>, vector<8x32xf32>,
    %c0_13 = arith.constant 0 : index
    %c0_14 = arith.constant 0 : index
    %38 = vector.load %arg7[%c0_13, %c0_14] : memref<8x1xf32, #tpu.memory_space<vmem>>, vector<8x1xf32>
    %39 = arith.extui %20 : vector<8x128xi1> to vector<8x128xi32>
    %40 = arith.sitofp %39 : vector<8x128xi32> to vector<8x128xf32>
    %cst_15 = arith.constant dense<0.000000e+00> : vector<8xf32>
    %41 = vector.multi_reduction <add>, %40, %cst_15 [1] : vector<8x128xf32> to vector<8xf32>
    %42 = vector.shape_cast %41 : vector<8xf32> to vector<8x1xf32>
    %43 = arith.addf %38, %42 : vector<8x1xf32>
    %c0_16 = arith.constant 0 : index
    %c0_17 = arith.constant 0 : index
    %44 = vector.load %arg7[%c0_16, %c0_17] : memref<8x1xf32, #tpu.memory_space<vmem>>, vector<8x1xf32>
    tpu.vector_store %arg7[%c0_16, %c0_17], %43 {strides = array<i32>} : memref<8x1xf32, #tpu.memory_space<vmem>>, vector<8x1xf32>,
    %c0_i32_18 = arith.constant 0 : i32
    %45 = arith.cmpi eq, %arg0, %c0_i32_18 : i32
    %46 = arith.extui %45 : i1 to i32
    %c0_i32_19 = arith.constant 0 : i32
    %47 = arith.cmpi ne, %46, %c0_i32_19 : i32
    scf.if %47 {
      %c0_20 = arith.constant 0 : index
      %c0_21 = arith.constant 0 : index
      %48 = vector.load %arg7[%c0_20, %c0_21] : memref<8x1xf32, #tpu.memory_space<vmem>>, vector<8x1xf32>
      %cst_22 = arith.constant 1.000000e+00 : f32
      %49 = vector.broadcast %cst_22 : f32 to vector<8x1xf32>
      %50 = arith.maximumf %48, %49 : vector<8x1xf32>
      %c0_23 = arith.constant 0 : index
      %c0_24 = arith.constant 0 : index
      %51 = vector.load %arg6[%c0_23, %c0_24] : memref<8x32xf32, #tpu.memory_space<vmem>>, vector<8x32xf32>
      %52 = vector.broadcast %50 : vector<8x1xf32> to vector<8x32xf32>
      %53 = arith.divf %51, %52 : vector<8x32xf32>
      %54 = arith.mulf %53, %53 : vector<8x32xf32>
      %cst_25 = arith.constant dense<0.000000e+00> : vector<8xf32>
      %55 = vector.multi_reduction <add>, %54, %cst_25 [1] : vector<8x32xf32> to vector<8xf32>
      %56 = vector.shape_cast %55 : vector<8xf32> to vector<8x1xf32>
      %cst_26 = arith.constant dense<0.000000e+00> : vector<8x8xf32>
      %57 = tpu.matmul %53, %53, %cst_26 {dimension_numbers = #tpu.dot_dimension_numbers<[1], [1], [0], [0], [0, 0, 1, 0], [], []>} : vector<8x32xf32>, vector<8x32xf32>, vector<8x8xf32> -> vector<8x8xf32>
      %58 = tpu.transpose %56, [1, 0] : vector<8x1xf32> -> vector<1x8xf32>
      %59 = vector.broadcast %56 : vector<8x1xf32> to vector<8x8xf32>
      %60 = vector.broadcast %58 : vector<1x8xf32> to vector<8x8xf32>
      %61 = arith.addf %59, %60 : vector<8x8xf32>
      %cst_27 = arith.constant 2.000000e+00 : f32
      %62 = vector.broadcast %cst_27 : f32 to vector<8x8xf32>
      %63 = arith.mulf %62, %57 : vector<8x8xf32>
      %64 = arith.subf %61, %63 : vector<8x8xf32>
      %65 = tpu.iota {dimensions = array<i32: 0>} : vector<8x8xi32>
      %66 = tpu.iota {dimensions = array<i32: 1>} : vector<8x8xi32>
      %67 = arith.cmpi eq, %65, %66 : vector<8x8xi32>
      %cst_28 = arith.constant 0.000000e+00 : f32
      %68 = vector.broadcast %cst_28 : f32 to vector<8x8xf32>
      %69 = arith.select %67, %64, %68 : vector<8x8xi1>, vector<8x8xf32>
      %cst_29 = arith.constant dense<0.000000e+00> : vector<8xf32>
      %70 = vector.multi_reduction <add>, %69, %cst_29 [1] : vector<8x8xf32> to vector<8xf32>
      %71 = vector.shape_cast %70 : vector<8xf32> to vector<8x1xf32>
      %cst_30 = arith.constant 9.99999996E-13 : f32
      %72 = vector.broadcast %cst_30 : f32 to vector<8x1xf32>
      %73 = arith.maximumf %71, %72 : vector<8x1xf32>
      %74 = math.sqrt %73 : vector<8x1xf32>
      %75 = vector.broadcast %3 : i32 to vector<8x8xi32>
      %76 = arith.cmpi slt, %66, %75 : vector<8x8xi32>
      %cst_31 = arith.constant dense<true> : vector<8x8xi1>
      %77 = arith.xori %67, %cst_31 : vector<8x8xi1>
      %78 = arith.andi %76, %77 : vector<8x8xi1>
      %cst_32 = arith.constant 1.000000e+30 : f32
      %79 = vector.broadcast %cst_32 : f32 to vector<8x8xf32>
      %80 = arith.select %78, %64, %79 : vector<8x8xi1>, vector<8x8xf32>
      %cst_33 = arith.constant dense<0x7F800000> : vector<8xf32>
      %81 = vector.multi_reduction <minimumf>, %80, %cst_33 [1] : vector<8x8xf32> to vector<8xf32>
      %82 = vector.shape_cast %81 : vector<8xf32> to vector<8x1xf32>
      %cst_34 = arith.constant 9.99999996E-13 : f32
      %83 = vector.broadcast %cst_34 : f32 to vector<8x1xf32>
      %84 = arith.maximumf %82, %83 : vector<8x1xf32>
      %85 = math.sqrt %84 : vector<8x1xf32>
      %86 = arith.subf %74, %85 : vector<8x1xf32>
      %cst_35 = arith.constant 2.000000e-01 : f32
      %87 = vector.broadcast %cst_35 : f32 to vector<8x1xf32>
      %88 = arith.addf %86, %87 : vector<8x1xf32>
      %cst_36 = arith.constant 0.000000e+00 : f32
      %89 = vector.broadcast %cst_36 : f32 to vector<8x1xf32>
      %90 = arith.maximumf %88, %89 : vector<8x1xf32>
      %91 = tpu.iota {dimensions = array<i32: 0>} : vector<8x1xi32>
      %92 = vector.broadcast %3 : i32 to vector<8x1xi32>
      %93 = arith.cmpi slt, %91, %92 : vector<8x1xi32>
      %cst_37 = arith.constant 0.000000e+00 : f32
      %94 = vector.broadcast %cst_37 : f32 to vector<8x1xf32>
      %95 = arith.select %93, %90, %94 : vector<8x1xi1>, vector<8x1xf32>
      %96 = vector.shape_cast %95 : vector<8x1xf32> to vector<1x8x1xf32>
      %cst_38 = arith.constant dense<0.000000e+00> : vector<1xf32>
      %97 = vector.multi_reduction <add>, %96, %cst_38 [1, 2] : vector<1x8x1xf32> to vector<1xf32>
      %98 = vector.shape_cast %97 : vector<1xf32> to vector<1x1x1xf32>
      %99 = vector.extract %98[0, 0, 0] : f32 from vector<1x1x1xf32>
      %100 = arith.sitofp %3 : i32 to f32
      %101 = arith.divf %99, %100 : f32
      %c0_39 = arith.constant 0 : index
      %c0_40 = arith.constant 0 : index
      %102 = memref.load %arg5[%c0_39, %c0_40] : memref<1x1xf32, #tpu.memory_space<smem>>
      memref.store %101, %arg5[%c0_39, %c0_40] : memref<1x1xf32, #tpu.memory_space<smem>>
    } else {
    }
    return
  }
  func.func @transform_0(%arg0: i32, %arg1: memref<2xi32, #tpu.memory_space<smem>>) -> (i32, i32) {
    %c0_i32 = arith.constant 0 : i32
    %c0_i32_0 = arith.constant 0 : i32
    %c0_i32_1 = arith.constant 0 : i32
    return %c0_i32, %c0_i32_0 : i32, i32
  }
  func.func @transform_1(%arg0: i32, %arg1: memref<2xi32, #tpu.memory_space<smem>>) -> (i32, i32) {
    %c0_i32 = arith.constant 0 : i32
    %c0_i32_0 = arith.constant 0 : i32
    return %c0_i32, %arg0 : i32, i32
  }
  func.func @transform_2(%arg0: i32, %arg1: memref<2xi32, #tpu.memory_space<smem>>) -> (i32, i32) {
    %c0_i32 = arith.constant 0 : i32
    %c0_i32_0 = arith.constant 0 : i32
    return %arg0, %c0_i32 : i32, i32
  }
  func.func @transform_3(%arg0: i32, %arg1: memref<2xi32, #tpu.memory_space<smem>>) -> (i32, i32) {
    %c0_i32 = arith.constant 0 : i32
    %c0_i32_0 = arith.constant 0 : i32
    %c0_i32_1 = arith.constant 0 : i32
    return %c0_i32, %c0_i32_0 : i32, i32
  }
}

</mosaic_0001>

<bundles_post_ra>
// kernel: tpu_custom_call.1
= control target key start
LH: loop header
LB: loop body
LE: loop exit
PB: predicated region body
PF: predicated region fallthrough
CT: control target
= control target key end

     0   :  { %s779_s0 = inlined_call_operand.vmem [shape: s32[2], index: 0, kind: input, shape index: {}]   ;;  %s780_s1 = inlined_call_operand.vmem [shape: s32[8,1], index: 1, kind: input, shape index: {}]   ;;  %s781_s2 = inlined_call_operand.vmem [shape: s32[1,8], index: 2, kind: input, shape index: {}]   ;;  %s782_s3 = inlined_call_operand.vmem [shape: f32[8,32], index: 3, kind: input, shape index: {}]   ;;  %s783_s4 = inlined_call_operand.hbm [shape: f32[1,1], index: 4, kind: output, shape index: {}]  }
   0x1   :  { %s9_s17 = sshll.u32 %s779_s0, 4  ;;  %s10_s17 = int_to_ptr.vmem [resolvable:$true] %s9_s17 }
   0x2   :  { %s575_s18 = scalar_lea.vmem %s10_s17, 16  ;;  %p580_p1 = scmp.lt.s32.totalorder %s10_s17, %s10_s17 }
   0x3   :  { %p576_p0 = scmp.ne.s32.totalorder %s10_s17, %s575_s18  ;;  %p581_p2 = scmp.lt.s32.totalorder %s575_s18, %s575_s18 }
   0x5   :  { %p582_p3 = por %p581_p2, %p580_p1 }
   0x7   :  { %p583_p4 = pnand %p582_p3, %p576_p0 }
   0x9   :  { %586 = shalt.err (!%p583_p4)  }
   0xa   :  { %s601_s19 = smov [#allocation5]  }
   0xb   :  { %12 = dma.vmem_to_smem %s10_s17, 16, %s601_s19, [#allocation4] }
   0xc   :  { %597 = dma.done.wait [#allocation4], 16 }
   0xd   :  { %598 = vsyncadd [#allocation4], 4294967280 }
   0xe   :  { %14 = sfence }
   0xf   :  { %v32_v0 = vld [vmem:[%s780_s1] sm:$0xff]  ;;  %s440_s22 = sld [smem:[#allocation5 + $0x1]]  ;;  %v34_v1 = vlaneseq  ;;  %v602_v2 = vmov 0   ;;  %v603_v3 = vmov 0.0|0.0   ;;  %v58_v6 = vld [vmem:[%s782_s3 + $0x8] sm:$0xff]  ;;  %vm604_vm0 = vmmov 0  }
  0x10   :  { %565 = vset.pattern.permute.xlu0 %v602_v2  ;;  %521 = vmatprep.subr.bf16.mxu0 %v603_v3  ;;  %v57_v5 = vld [vmem:[%s782_s3] sm:$0xff]  ;;  %v605_v10 = vmov 0.0   ;;  %v59_v13 = vld [vmem:[%s782_s3 + $0x10] sm:$0xff]  ;;  %v60_v14 = vld [vmem:[%s782_s3 + $0x18] sm:$0xff] }
  0x11   :  { %42 = vperm.xlu0 %565, %v32_v0   ;;  %v642_v4 = vshrl.u32 %v34_v1, 7  ;;  %566 = vset.pattern.permute.xlu1 %v602_v2  ;;  %v522_v11 = vpack.c.bf16 %v58_v6, %v57_v5 }
  0x12   :  { %513 = vmatprep.mubr.msk.f32.mxu0 %vm604_vm0, %v605_v10  ;;  %516 = vmatprep.subr.mxu1 %v605_v10 }
  0x13   :  { %v73_v7 = vadd.s32 8, %v642_v4  ;;  %v74_v8 = vadd.s32 16, %v642_v4  ;;  %v75_v9 = vadd.s32 24, %v642_v4  ;;  %518 = vmatprep.mubr.msk.f32.mxu1 %vm604_vm0, %v605_v10  ;;  %v76_v15 = vadd.s32 32, %v642_v4 }
  0x14   :  { %v77_v16 = vadd.s32 40, %v642_v4 }
  0x15   :  { %v656_v12 = vstv %s440_s22 }
  0x16   :  { %vm104_vm1 = vcmp.lt.s32.totalorder %v642_v4, %v656_v12  ;;  %vm105_vm2 = vcmp.lt.s32.totalorder %v73_v7, %v656_v12  ;;  %vm106_vm3 = vcmp.lt.s32.totalorder %v74_v8, %v656_v12  ;;  %vm107_vm4 = vcmp.lt.s32.totalorder %v75_v9, %v656_v12 }
  0x17   :  { %15 = vsyncpa [#allocation7], 0  ;;  %v526_v17 = vpack.c.bf16 %v60_v14, %v59_v13  ;;  %v61_v18 = vld [vmem:[%s782_s3 + $0x20] sm:$0xff]  ;;  %v62_v19 = vld [vmem:[%s782_s3 + $0x28] sm:$0xff]  ;;  %vm108_vm7 = vcmp.lt.s32.totalorder %v76_v15, %v656_v12  ;;  %vm109_vm8 = vcmp.lt.s32.totalorder %v77_v16, %v656_v12  ;;  %v78_v20 = vadd.s32 48, %v642_v4  ;;  %s738_s1 = sld [smem:[#allocation5]] }
  0x18   :  { %vm523_vm5 = vmpackc.low %vm105_vm2, %vm104_vm1  ;;  %v79_v21 = vadd.s32 56, %v642_v4  ;;  %v530_v22 = vpack.c.bf16 %v62_v19, %v61_v18  ;;  %vm28_vm9 = vcmask 7168   ;;  %v63_v23 = vld [vmem:[%s782_s3 + $0x30] sm:$0xff]  ;;  %v64_v24 = vld [vmem:[%s782_s3 + $0x38] sm:$0xff]  ;;  %v80_v25 = vadd.s32 64, %v642_v4  ;;  %s587_s6 = scalar_lea.hbm %s783_s4, 16 }
  0x19   :  { %524 = vmatpush3.bf16.msk.msra.mxu0 %vm523_vm5, %v522_v11  ;;  %vm527_vm6 = vmpackc.low %vm107_vm4, %vm106_vm3  ;;  %29 = vst.msk [vmem:[#allocation3] sm:$0xff] %vm28_vm9, %v605_v10  ;;  %vm110_vm11 = vcmp.lt.s32.totalorder %v78_v20, %v656_v12  ;;  %v81_v26 = vadd.s32 72, %v642_v4  ;;  %v534_v27 = vpack.c.bf16 %v64_v24, %v63_v23  ;;  %v65_v28 = vld [vmem:[%s782_s3 + $0x40] sm:$0xff]  ;;  %v66_v29 = vld [vmem:[%s782_s3 + $0x48] sm:$0xff]  ;;  %v82_v30 = vadd.s32 80, %v642_v4  ;;  %p588_p5 = scmp.ne.s32.totalorder %s783_s4, %s587_s6  ;;  %p591_p6 = scmp.lt.u32.totalorder %s587_s6, %s783_s4 }
  0x1a   :  { %525 = vmatprep.subr.bf16.mxu0 %v603_v3  ;;  %vm531_vm10 = vmpackc.low %vm109_vm8, %vm108_vm7  ;;  %vm111_vm12 = vcmp.lt.s32.totalorder %v79_v21, %v656_v12  ;;  %vm112_vm14 = vcmp.lt.s32.totalorder %v80_v25, %v656_v12  ;;  %v83_v31 = vadd.s32 88, %v642_v4  ;;  %v538_v32 = vpack.c.bf16 %v66_v29, %v65_v28  ;;  %v67_v33 = vld [vmem:[%s782_s3 + $0x50] sm:$0xff]  ;;  %v68_v34 = vld [vmem:[%s782_s3 + $0x58] sm:$0xff] }
  0x1b   :  { %vm535_vm13 = vmpackc.low %vm111_vm12, %vm110_vm11  ;;  %vm113_vm15 = vcmp.lt.s32.totalorder %v81_v26, %v656_v12  ;;  %vm114_vm1 = vcmp.lt.s32.totalorder %v82_v30, %v656_v12  ;;  %v84_v35 = vadd.s32 96, %v642_v4  ;;  %v85_v36 = vadd.s32 104, %v642_v4  ;;  %v69_v38 = vld [vmem:[%s782_s3 + $0x60] sm:$0xff]  ;;  %v70_v39 = vld [vmem:[%s782_s3 + $0x68] sm:$0xff]  ;;  %p593_p7 = pnand %p591_p6, %p588_p5 }
  0x1c   :  { %vm539_vm0 = vmpackc.low %vm113_vm15, %vm112_vm14  ;;  %vm115_vm2 = vcmp.lt.s32.totalorder %v83_v31, %v656_v12  ;;  %v542_v37 = vpack.c.bf16 %v68_v34, %v67_v33  ;;  %v86_v40 = vadd.s32 112, %v642_v4  ;;  %v87_v41 = vadd.s32 120, %v642_v4  ;;  %v71_v43 = vld [vmem:[%s782_s3 + $0x70] sm:$0xff]  ;;  %v72_v44 = vld [vmem:[%s782_s3 + $0x78] sm:$0xff] }
  0x1d   :  { %528 = vmatpush3.bf16.msk.msra.mxu0 %vm527_vm6, %v526_v17  ;;  %vm543_vm3 = vmpackc.low %vm115_vm2, %vm114_vm1  ;;  %vm116_vm4 = vcmp.lt.s32.totalorder %v84_v35, %v656_v12  ;;  %vm117_vm5 = vcmp.lt.s32.totalorder %v85_v36, %v656_v12  ;;  %v546_v42 = vpack.c.bf16 %v70_v39, %v69_v38  ;;  %v550_v45 = vpack.c.bf16 %v72_v44, %v71_v43  ;;  %v441_v48 = vld [vmem:[%s781_s2] ss:$0 sm:$0xff]  ;;  %s420_s2 = scvt.s32.f32 %s738_s1 }
  0x1e   :  { %529 = vmatprep.subr.bf16.mxu0 %v603_v3  ;;  %vm547_vm6 = vmpackc.low %vm117_vm5, %vm116_vm4  ;;  %vm118_vm7 = vcmp.lt.s32.totalorder %v86_v40, %v656_v12  ;;  %vm119_vm8 = vcmp.lt.s32.totalorder %v87_v41, %v656_v12  ;;  %v35_v46 = vand.u32 127, %v34_v1  ;;  %v52_v47 = vstv %s738_s1 }
  0x1f   :  { %vm747_vm12 = vcmp.lt.s32.totalorder %v642_v4, %v52_v47  ;;  %v606_v51 = vmov 1.0   ;;  %v372_v8 = vsub.s32 0, %v642_v4  ;;  %vm379_vm5 = vcmask 64512  }
  0x20   :  { %vm50_vm11 = vcmp.lt.s32.totalorder %v35_v46, %v656_v12  ;;  %v242_v53 = vld [vmem:[#allocation3] sm:$0xff]  ;;  %vm377_vm1 = vcmp.eq.s32.totalorder %v642_v4, %v35_v46  ;;  %vm391_vm2 = vcmp.lt.s32.totalorder %v35_v46, %v52_v47  ;;  %v421_v36 = vstv %s420_s2 }
  0x21   :  { %532 = vmatpush3.bf16.msk.msra.mxu0 %vm531_vm10, %v530_v22  ;;  %vm551_vm10 = vmpackc.low %vm119_vm8, %vm118_vm7 }
  0x22   :  { %533 = vmatprep.subr.bf16.mxu0 %v603_v3 }
  0x25   :  { %536 = vmatpush3.bf16.msk.msra.mxu0 %vm535_vm13, %v534_v27 }
  0x26   :  { %537 = vmatprep.subr.bf16.mxu0 %v603_v3 }
  0x29   :  { %540 = vmatpush3.bf16.msk.msra.mxu0 %vm539_vm0, %v538_v32  ;;  %vm26_vm0 = vcmask 261120  }
  0x2a   :  { %541 = vmatprep.subr.bf16.mxu0 %v603_v3  ;;  %27 = vst.msk [vmem:[#allocation2] sm:$0xff] %vm26_vm0, %v605_v10 }
  0x2d   :  { %544 = vmatpush3.bf16.msk.msra.mxu0 %vm543_vm3, %v542_v37  ;;  %vm607_vm3 = vmmov 1  }
  0x2e   :  { %545 = vmatprep.subr.bf16.mxu0 %v603_v3  ;;  %vm392_vm4 = vmxor %vm377_vm1, %vm607_vm3 }
  0x31   :  { %548 = vmatpush3.bf16.msk.msra.mxu0 %vm547_vm6, %v546_v42  ;;  %v168_v58 = vld [vmem:[#allocation2] sm:$0xff]  ;;  %vm393_vm6 = vmand %vm391_vm2, %vm392_vm4 }
  0x32   :  { %549 = vmatprep.subr.bf16.mxu0 %v603_v3 }
  0x35   :  { %552 = vmatpush3.bf16.msk.msra.mxu0 %vm551_vm10, %v550_v45 }
  0x90   :  { %v43_v49 = vpop.permute.xlu0 %42 }
  0x91   :  { %vm48_vm13 = vcmp.eq.s32.totalorder %v43_v49, %v441_v48 }
  0x92   :  { %vm51_vm14 = vmand %vm48_vm13, %vm50_vm11 }
  0x93   :  { %vm54_vm15 = vmand %vm51_vm14, %vm747_vm12 }
  0x94   :  { %514 = vmatmul.mubr.msk.f32.vlgmr.msra.gmra.mrb[0].mxu0 %vm54_vm15, %v606_v51  ;;  %v442_v52 = vsel %vm54_vm15, 1.0, %v605_v10 }
  0x95   :  { %243 = vadd.xlane.f32.xlu0 %v442_v52 }
 0x122   :  { %v244_v54 = vpop.xlane.xlu0 %243 }
 0x123   :  { %v245_v55 = vadd.f32 %v244_v54, %v242_v53 }
 0x125   :  { %247 = vst.msk [vmem:[#allocation3] sm:$0xff] %vm28_vm9, %v245_v55 }
 0x12c   :  { %v251_v56 = vld [vmem:[#allocation3] sm:$0xff] }
 0x12d   :  { %v252_v57 = vmax.f32 %v251_v56, 1.0 }
 0x12f   :  { %256 = vperm.xlu1 %566, %v252_v57  }
 0x167   :  { %v235_v59 = vpop.f32.mrb[0].mxu0 }
 0x168   :  { %v239_v60 = vadd.f32 %v235_v59, %v168_v58  ;;  %v515_v61 = vpop.f32.mrb[1].mxu0 }
 0x16a   :  { %241 = vst.msk [vmem:[#allocation2] sm:$0xff] %vm26_vm0, %v239_v60 }
 0x171   :  { %v253_v0 = vld [vmem:[#allocation2] sm:$0xff] }
 0x1ae   :  { %v257_v62 = vpop.permute.xlu1 %256 }
 0x1af   :  { %567 = vrcp.f32 %v257_v62 }
 0x1b9   :  { %v568_v63 = vpop.eup %567 }
 0x1ba   :  { %v260_v1 = vmul.f32 %v568_v63, %v253_v0 }
 0x1bc   :  { %517 = vmatpush3.xpose.msk.msra.mxu1 %vm26_vm0, %v260_v1  ;;  %v261_v2 = vmul.f32 %v260_v1, %v260_v1 }
 0x1be   :  { %v262_v3 = vsel %vm26_vm0, %v261_v2, 0.0 }
 0x1bf   :  { %519 = vmatmul.mubr.msk.f32.vlgmr.msra.gmra.mrb[0].mxu1 %vm26_vm0, %v260_v1  ;;  %263 = vadd.xlane.f32.xlu1 %v262_v3 }
 0x24c   :  { %v264_v5 = vpop.xlane.xlu1 %263 }
 0x24d   :  { %338 = vxpose.xlu0.b32.start.end [1/1] (short) (narrow) %v264_v5, 8 }
 0x292   :  { %v334_v6 = vpop.f32.mrb[0].mxu1 }
 0x293   :  { %v520_v7 = vpop.f32.mrb[1].mxu1  ;;  %v375_v11 = vmul.f32 2.0, %v334_v6 }
 0x2cd   :  { %v354_v9 = vpop.trf.xlu0 }
 0x2ce   :  { %v373_v10 = vrot.slane %v354_v9, %v372_v8 }
 0x2d0   :  { %v374_v12 = vadd.f32 %v373_v10, %v264_v5 }
 0x2d2   :  { %v376_v13 = vsub.f32 %v374_v12, %v375_v11 }
 0x2d4   :  { %v378_v14 = vsel %vm377_vm1, %v376_v13, 0.0  ;;  %v394_v16 = vsel %vm393_vm6, %v376_v13, 1e+30 }
 0x2d5   :  { %v380_v15 = vsel %vm379_vm5, %v378_v14, 0.0  ;;  %v395_v17 = vsel %vm379_vm5, %v394_v16, inf }
 0x2d6   :  { %381 = vadd.xlane.f32.xlu1 %v380_v15 }
 0x2da   :  { %396 = vmin.xlane.f32.xlu1 %v395_v17 }
 0x363   :  { %v382_v18 = vpop.xlane.xlu1 %381 }
 0x364   :  { %v383_v19 = vmax.f32 %v382_v18, 1e-12 }
 0x366   :  { %569 = vrsqrt.f32 %v383_v19  ;;  %vm386_vm7 = vcmp.eq.f32.partialorder %v383_v19, inf  ;;  %v389_v26 = vand.u32 2147483648, %v383_v19  ;;  %vm388_vm10 = vcmp.eq.f32.partialorder %v383_v19, 0.0 }
 0x367   :  { %v397_v20 = vpop.xlane.xlu1 %396 }
 0x368   :  { %v398_v4 = vmax.f32 %v397_v20, 1e-12 }
 0x36a   :  { %571 = vrsqrt.f32 %v398_v4  ;;  %vm401_vm8 = vcmp.eq.f32.partialorder %v398_v4, inf  ;;  %v404_v27 = vand.u32 2147483648, %v398_v4  ;;  %vm403_vm11 = vcmp.eq.f32.partialorder %v398_v4, 0.0 }
 0x36b   :  { %573 = vrcp.f32 %v421_v36 }
 0x370   :  { %v570_v21 = vpop.eup %569 }
 0x371   :  { %v385_v22 = vmul.f32 %v570_v21, %v383_v19 }
 0x373   :  { %v387_v24 = vsel %vm386_vm7, %v383_v19, %v385_v22 }
 0x374   :  { %v572_v23 = vpop.eup %571  ;;  %v390_v29 = vsel %vm388_vm10, %v389_v26, %v387_v24 }
 0x375   :  { %v400_v25 = vmul.f32 %v572_v23, %v398_v4  ;;  %v574_v43 = vpop.eup %573 }
 0x377   :  { %v402_v28 = vsel %vm401_vm8, %v398_v4, %v400_v25 }
 0x378   :  { %v405_v30 = vsel %vm403_vm11, %v404_v27, %v402_v28 }
 0x379   :  { %v406_v31 = vsub.f32 %v390_v29, %v405_v30 }
 0x37b   :  { %v407_v32 = vadd.f32 0.2, %v406_v31 }
 0x37d   :  { %v408_v33 = vmax.f32 %v407_v32, 0.0 }
 0x37f   :  { %v409_v34 = vsel %vm747_vm12, %v408_v33, 0.0 }
 0x380   :  { %v410_v35 = vsel %vm28_vm9, %v409_v34, 0.0 }
 0x381   :  { %411 = vadd.xlane.f32.xlu1 %v410_v35 }
 0x40e   :  { %v412_v37 = vpop.xlane.xlu1 %411 }
 0x40f   :  { %v413_v38 = vrot.slane %v412_v37, 4 }
 0x411   :  { %v414_v39 = vadd.f32 %v413_v38, %v412_v37 }
 0x413   :  { %v415_v40 = vrot.slane %v414_v39, 2 }
 0x415   :  { %v416_v41 = vadd.f32 %v415_v40, %v414_v39 }
 0x417   :  { %v417_v42 = vrot.slane %v416_v41, 1 }
 0x419   :  { %v418_v44 = vadd.f32 %v417_v42, %v416_v41 }
 0x41b   :  { %553 = vpush %v418_v44 }
 0x41c   :  { %555 = vpush %v574_v43 }
 0x44c   :  { %s554_s3 = spop %553 }
 0x44d   :  { %s556_s28 = spop %555 }
 0x44e   :  { %s424_s29 = smul.f32 %s556_s28, %s554_s3 }
 0x450   :  { %426 = sst [smem:[#allocation6]] %s424_s29 }
 0x451   :  { %596 = shalt.err (!%p593_p7)
}
 0x452   :  { %s608_s11 = smov [#allocation6]  }
 0x453   :  { %434 = dma.smem_to_hbm %s608_s11, 16, %s783_s4, [#allocation7]  }
 0x454   :  { %599 = dma.done.wait [#allocation7], 16  }
 0x455   :  { %600 = vsyncadd [#allocation7], 4294967280 }
 0x456   :  { %438 = sfence }
 0x457   :  { %439 = vsyncpa [#allocation7], 1 }

</bundles_post_ra>
